<compile_context>
chip_gen: v7x
topology: tpu7x:2x2x1
jax: 0.10.0
libtpu: 0.0.40
codegen_flags: <defaults>
</compile_context>

<pallas_src>
import jax
import jax.numpy as jnp
from jax.experimental import pallas as pl
from jax.experimental.pallas import tpu as pltpu

LANE = 128
SUBLANE = 8
# Conservative single-block row cap: ~3 KB/row f32 (double-buffered x/out blocks
# + h1/h2 temporaries) sized against the smallest scoped-VMEM default (v5e 16 MiB,
# v7x 32 MiB of 64 MiB physical).  2048 rows ~= 6 MB, safe on every generation.
# TODO(synk): derive per-generation via pltpu.get_tpu_info() if large-B matters.
MAX_ROWS_PER_BLOCK = 2048


def _round_up(x, m):
    return ((x + m - 1) // m) * m


def mlp_kernel(x_ref, w1_ref, b1_ref, w2_ref, b2_ref, w3_ref, b3_ref, o_ref):
    x = x_ref[...]
    in_dim = w1_ref.shape[0]            # static (4)

    # fc1 + relu on the VPU: K=in_dim is tiny, so `in_dim` broadcast FMAs over
    # lane-dense (tm, 128) vregs instead of a 97%-padded MXU pass.
    h1 = b1_ref[...]
    for k in range(in_dim):             # static trip count
        h1 = h1 + x[:, k:k + 1] * w1_ref[k:k + 1, :]
    h1 = jnp.maximum(h1, 0.0)

    # fc2 + relu (lane-dense 128x128 MXU pass, f32 accumulate)
    h2 = jnp.dot(h1, w2_ref[...], preferred_element_type=jnp.float32) + b2_ref[...]
    h2 = jnp.maximum(h2, 0.0)

    # fc3 (logits, zero-padded to 128 output lanes -> unmasked, aligned store)
    out = jnp.dot(h2, w3_ref[...], preferred_element_type=jnp.float32) + b3_ref[...]
    o_ref[...] = out.astype(o_ref.dtype)


def prepare_params(params):
    """One-time lane-dense padding of parameters (call at init, NOT per forward).

    hidden -> round_up(hidden, 128), output -> round_up(output, 128).
    w2 is zero-padded along BOTH input and output dims and b2 along its lane dim,
    so padded hidden units stay exactly zero through the ReLUs and leak nothing
    into fc3.  Returns (padded_param_dict, out_dim).
    """
    w1, b1, w2, b2, w3, b3 = (params[k] for k in ("w1", "b1", "w2", "b2", "w3", "b3"))
    in_dim, hidden = w1.shape
    out_dim = w3.shape[1]
    hp = _round_up(hidden, LANE)
    op = _round_up(out_dim, LANE)

    def pad2(a, shape):
        return jnp.zeros(shape, a.dtype).at[: a.shape[0], : a.shape[1]].set(a)

    prepared = {
        "w1": pad2(w1, (in_dim, hp)), "b1": pad2(b1, (1, hp)),
        "w2": pad2(w2, (hp, hp)),     "b2": pad2(b2, (1, hp)),
        "w3": pad2(w3, (hp, op)),     "b3": pad2(b3, (1, op)),
    }
    return prepared, out_dim


def policy_network_forward(x, prepared, out_dim, *, strip_padding=True):
    """x: (B, input) f32.  `prepared` from prepare_params (lane-padded, done once)."""
    w1, b1, w2, b2, w3, b3 = (prepared[k] for k in ("w1", "b1", "w2", "b2", "w3", "b3"))
    B, in_dim = x.shape
    op = w3.shape[1]

    # Tiling: one block if it fits the VMEM row cap; otherwise an even split
    # with the step count rounded to a multiple of 2 (v7x megacore balance).
    bp8 = _round_up(B, SUBLANE)
    if bp8 <= MAX_ROWS_PER_BLOCK:
        n_steps = 1
    else:
        n_steps = _round_up(-(-bp8 // MAX_ROWS_PER_BLOCK), 2)
    tm = _round_up(-(-bp8 // n_steps), SUBLANE)
    Bp = n_steps * tm
    xp = x if Bp == B else jnp.pad(x, ((0, Bp - B), (0, 0)))  # at most a few sublanes

    # Grid-invariant (VMEM-resident) parameter blocks: same block index every
    # grid step -> DMA'd once, not per tile.
    const = lambda a: pl.BlockSpec(a.shape, lambda i: (0, 0))

    out = pl.pallas_call(
        mlp_kernel,
        out_shape=jax.ShapeDtypeStruct((Bp, op), x.dtype),
        grid=(n_steps,),
        in_specs=[
            pl.BlockSpec((tm, in_dim), lambda i: (i, 0)),   # x: tiled over batch
            const(w1), const(b1),
            const(w2), const(b2),
            const(w3), const(b3),
        ],
        out_specs=pl.BlockSpec((tm, op), lambda i: (i, 0)),
        compiler_params=pltpu.CompilerParams(
            dimension_semantics=("parallel",),
        ),
    )(xp, w1, b1, w2, b2, w3, b3)

    if strip_padding:
        # Matches the PyTorch module's (B, output) semantics. Latency-sensitive
        # consumers can pass strip_padding=False and index the padded buffer
        # themselves (padded rows/lanes are numerically inert).
        return out[:B, :out_dim]
    return out


def init_params(key, input_dim=4, hidden=64, output=2, dtype=jnp.float32):
    """Deterministic init matching nn.Linear's default U(-1/sqrt(fan_in), +1/sqrt(fan_in)).
    Weights stored as (in, out) so y = x @ W + b (== PyTorch x @ W.T + b)."""
    def linear(key, fan_in, fan_out):
        kw, kb = jax.random.split(key)
        bound = 1.0 / jnp.sqrt(fan_in)
        w = jax.random.uniform(kw, (fan_in, fan_out), dtype, -bound, bound)
        b = jax.random.uniform(kb, (1, fan_out), dtype, -bound, bound)
        return w, b

    k1, k2, k3 = jax.random.split(key, 3)
    w1, b1 = linear(k1, input_dim, hidden)
    w2, b2 = linear(k2, hidden, hidden)
    w3, b3 = linear(k3, hidden, output)
    return {"w1": w1, "b1": b1, "w2": w2, "b2": b2, "w3": w3, "b3": b3}


def reference_forward(x, p):
    h1 = jnp.maximum(x @ p["w1"] + p["b1"], 0.0)
    h2 = jnp.maximum(h1 @ p["w2"] + p["b2"], 0.0)
    return h2 @ p["w3"] + p["b3"]


if __name__ == "__main__":
    key = jax.random.PRNGKey(0)
    kx, kp, kx2 = jax.random.split(key, 3)

    B, INPUT, HIDDEN, OUTPUT = 8, 4, 64, 2
    params = init_params(kp, INPUT, HIDDEN, OUTPUT)
    prepared, out_dim = prepare_params(params)      # one-time padding (not per call)

    # Small batch (single grid step, exercises hidden/output lane padding).
    x = jax.random.normal(kx, (B, INPUT), jnp.float32)
    out = jax.block_until_ready(policy_network_forward(x, prepared, out_dim))
    ref = reference_forward(x, params)
    assert out.shape == (B, OUTPUT), out.shape
    assert jnp.allclose(out, ref, atol=1e-5, rtol=1e-5), "mismatch vs reference (small batch)"

    # Larger, non-multiple batch: still a single block (608 rows), only 8 pad rows.
    B2 = 600
    x2 = jax.random.normal(kx2, (B2, INPUT), jnp.float32)
    out2 = jax.block_until_ready(policy_network_forward(x2, prepared, out_dim))
    ref2 = reference_forward(x2, params)
    assert out2.shape == (B2, OUTPUT), out2.shape
    assert jnp.allclose(out2, ref2, atol=1e-5, rtol=1e-5), "mismatch vs reference (large batch)"

    # Padded-output fast path (skips the post-kernel slice dispatch).
    out2_padded = jax.block_until_ready(
        policy_network_forward(x2, prepared, out_dim, strip_padding=False))
    assert out2_padded.shape[1] == 128, out2_padded.shape
    assert jnp.allclose(out2_padded[:B2, :OUTPUT], ref2, atol=1e-5, rtol=1e-5)

    print("KERNEL_OK")
</pallas_src>

<mosaic_0001>
module attributes {stable_mosaic.version = 11 : i64} {
  func.func @mlp_kernel(%arg0: i32, %arg1: memref<8x4xf32, #tpu.memory_space<vmem>>, %arg2: memref<4x128xf32, #tpu.memory_space<vmem>>, %arg3: memref<1x128xf32, #tpu.memory_space<vmem>>, %arg4: memref<128x128xf32, #tpu.memory_space<vmem>>, %arg5: memref<1x128xf32, #tpu.memory_space<vmem>>, %arg6: memref<128x128xf32, #tpu.memory_space<vmem>>, %arg7: memref<1x128xf32, #tpu.memory_space<vmem>>, %arg8: memref<8x128xf32, #tpu.memory_space<vmem>>) attributes {dimension_semantics = [#tpu.dimension_semantics<parallel>], iteration_bounds = array<i64: 1>, scalar_prefetch = 0 : i64, scratch_operands = 0 : i64, tpu.core_type = #tpu.core_type<tc>, window_params = [{transform_indices = @transform_0, window_bounds = array<i64: 8, 4>}, {pipeline_mode = #tpu.pipeline_mode<synchronous>, transform_indices = @transform_1, window_bounds = array<i64: 4, 128>}, {pipeline_mode = #tpu.pipeline_mode<synchronous>, transform_indices = @transform_2, window_bounds = array<i64: 1, 128>}, {pipeline_mode = #tpu.pipeline_mode<synchronous>, transform_indices = @transform_3, window_bounds = array<i64: 128, 128>}, {pipeline_mode = #tpu.pipeline_mode<synchronous>, transform_indices = @transform_4, window_bounds = array<i64: 1, 128>}, {pipeline_mode = #tpu.pipeline_mode<synchronous>, transform_indices = @transform_5, window_bounds = array<i64: 128, 128>}, {pipeline_mode = #tpu.pipeline_mode<synchronous>, transform_indices = @transform_6, window_bounds = array<i64: 1, 128>}, {transform_indices = @transform_7, window_bounds = array<i64: 8, 128>}]} {
    %c0 = arith.constant 0 : index
    %c0_0 = arith.constant 0 : index
    %0 = vector.load %arg1[%c0, %c0_0] : memref<8x4xf32, #tpu.memory_space<vmem>>, vector<8x4xf32>
    %c0_1 = arith.constant 0 : index
    %c0_2 = arith.constant 0 : index
    %1 = vector.load %arg3[%c0_1, %c0_2] : memref<1x128xf32, #tpu.memory_space<vmem>>, vector<1x128xf32>
    %2 = vector.extract_strided_slice %0 {offsets = [0, 0], sizes = [8, 1], strides = [1, 1]} : vector<8x4xf32> to vector<8x1xf32>
    %c0_3 = arith.constant 0 : index
    %c0_4 = arith.constant 0 : index
    %3 = vector.load %arg2[%c0_3, %c0_4] : memref<4x128xf32, #tpu.memory_space<vmem>>, vector<1x128xf32>
    %4 = vector.broadcast %2 : vector<8x1xf32> to vector<8x128xf32>
    %5 = vector.broadcast %3 : vector<1x128xf32> to vector<8x128xf32>
    %6 = arith.mulf %4, %5 : vector<8x128xf32>
    %7 = vector.broadcast %1 : vector<1x128xf32> to vector<8x128xf32>
    %8 = arith.addf %7, %6 : vector<8x128xf32>
    %9 = vector.extract_strided_slice %0 {offsets = [0, 1], sizes = [8, 1], strides = [1, 1]} : vector<8x4xf32> to vector<8x1xf32>
    %c1 = arith.constant 1 : index
    %c0_5 = arith.constant 0 : index
    %10 = vector.load %arg2[%c1, %c0_5] : memref<4x128xf32, #tpu.memory_space<vmem>>, vector<1x128xf32>
    %11 = vector.broadcast %9 : vector<8x1xf32> to vector<8x128xf32>
    %12 = vector.broadcast %10 : vector<1x128xf32> to vector<8x128xf32>
    %13 = arith.mulf %11, %12 : vector<8x128xf32>
    %14 = arith.addf %8, %13 : vector<8x128xf32>
    %15 = vector.extract_strided_slice %0 {offsets = [0, 2], sizes = [8, 1], strides = [1, 1]} : vector<8x4xf32> to vector<8x1xf32>
    %c2 = arith.constant 2 : index
    %c0_6 = arith.constant 0 : index
    %16 = vector.load %arg2[%c2, %c0_6] : memref<4x128xf32, #tpu.memory_space<vmem>>, vector<1x128xf32>
    %17 = vector.broadcast %15 : vector<8x1xf32> to vector<8x128xf32>
    %18 = vector.broadcast %16 : vector<1x128xf32> to vector<8x128xf32>
    %19 = arith.mulf %17, %18 : vector<8x128xf32>
    %20 = arith.addf %14, %19 : vector<8x128xf32>
    %21 = vector.extract_strided_slice %0 {offsets = [0, 3], sizes = [8, 1], strides = [1, 1]} : vector<8x4xf32> to vector<8x1xf32>
    %c3 = arith.constant 3 : index
    %c0_7 = arith.constant 0 : index
    %22 = vector.load %arg2[%c3, %c0_7] : memref<4x128xf32, #tpu.memory_space<vmem>>, vector<1x128xf32>
    %23 = vector.broadcast %21 : vector<8x1xf32> to vector<8x128xf32>
    %24 = vector.broadcast %22 : vector<1x128xf32> to vector<8x128xf32>
    %25 = arith.mulf %23, %24 : vector<8x128xf32>
    %26 = arith.addf %20, %25 : vector<8x128xf32>
    %cst = arith.constant 0.000000e+00 : f32
    %27 = vector.broadcast %cst : f32 to vector<8x128xf32>
    %28 = arith.maximumf %26, %27 : vector<8x128xf32>
    %c0_8 = arith.constant 0 : index
    %c0_9 = arith.constant 0 : index
    %29 = vector.load %arg4[%c0_8, %c0_9] : memref<128x128xf32, #tpu.memory_space<vmem>>, vector<128x128xf32>
    %cst_10 = arith.constant dense<0.000000e+00> : vector<8x128xf32>
    %30 = tpu.matmul %28, %29, %cst_10 {dimension_numbers = #tpu.dot_dimension_numbers<[1], [0], [0], [1], [0, 0, 1, 1], [], []>} : vector<8x128xf32>, vector<128x128xf32>, vector<8x128xf32> -> vector<8x128xf32>
    %c0_11 = arith.constant 0 : index
    %c0_12 = arith.constant 0 : index
    %31 = vector.load %arg5[%c0_11, %c0_12] : memref<1x128xf32, #tpu.memory_space<vmem>>, vector<1x128xf32>
    %32 = vector.broadcast %31 : vector<1x128xf32> to vector<8x128xf32>
    %33 = arith.addf %30, %32 : vector<8x128xf32>
    %cst_13 = arith.constant 0.000000e+00 : f32
    %34 = vector.broadcast %cst_13 : f32 to vector<8x128xf32>
    %35 = arith.maximumf %33, %34 : vector<8x128xf32>
    %c0_14 = arith.constant 0 : index
    %c0_15 = arith.constant 0 : index
    %36 = vector.load %arg6[%c0_14, %c0_15] : memref<128x128xf32, #tpu.memory_space<vmem>>, vector<128x128xf32>
    %cst_16 = arith.constant dense<0.000000e+00> : vector<8x128xf32>
    %37 = tpu.matmul %35, %36, %cst_16 {dimension_numbers = #tpu.dot_dimension_numbers<[1], [0], [0], [1], [0, 0, 1, 1], [], []>} : vector<8x128xf32>, vector<128x128xf32>, vector<8x128xf32> -> vector<8x128xf32>
    %c0_17 = arith.constant 0 : index
    %c0_18 = arith.constant 0 : index
    %38 = vector.load %arg7[%c0_17, %c0_18] : memref<1x128xf32, #tpu.memory_space<vmem>>, vector<1x128xf32>
    %39 = vector.broadcast %38 : vector<1x128xf32> to vector<8x128xf32>
    %40 = arith.addf %37, %39 : vector<8x128xf32>
    %c0_19 = arith.constant 0 : index
    %c0_20 = arith.constant 0 : index
    %41 = vector.load %arg8[%c0_19, %c0_20] : memref<8x128xf32, #tpu.memory_space<vmem>>, vector<8x128xf32>
    tpu.vector_store %arg8[%c0_19, %c0_20], %40 {strides = array<i32>} : memref<8x128xf32, #tpu.memory_space<vmem>>, vector<8x128xf32>,
    return
  }
  func.func @transform_0(%arg0: i32) -> (i32, i32) {
    %c0_i32 = arith.constant 0 : i32
    %c0_i32_0 = arith.constant 0 : i32
    return %arg0, %c0_i32 : i32, i32
  }
  func.func @transform_1(%arg0: i32) -> (i32, i32) {
    %c0_i32 = arith.constant 0 : i32
    %c0_i32_0 = arith.constant 0 : i32
    %c0_i32_1 = arith.constant 0 : i32
    return %c0_i32, %c0_i32_0 : i32, i32
  }
  func.func @transform_2(%arg0: i32) -> (i32, i32) {
    %c0_i32 = arith.constant 0 : i32
    %c0_i32_0 = arith.constant 0 : i32
    %c0_i32_1 = arith.constant 0 : i32
    return %c0_i32, %c0_i32_0 : i32, i32
  }
  func.func @transform_3(%arg0: i32) -> (i32, i32) {
    %c0_i32 = arith.constant 0 : i32
    %c0_i32_0 = arith.constant 0 : i32
    %c0_i32_1 = arith.constant 0 : i32
    return %c0_i32, %c0_i32_0 : i32, i32
  }
  func.func @transform_4(%arg0: i32) -> (i32, i32) {
    %c0_i32 = arith.constant 0 : i32
    %c0_i32_0 = arith.constant 0 : i32
    %c0_i32_1 = arith.constant 0 : i32
    return %c0_i32, %c0_i32_0 : i32, i32
  }
  func.func @transform_5(%arg0: i32) -> (i32, i32) {
    %c0_i32 = arith.constant 0 : i32
    %c0_i32_0 = arith.constant 0 : i32
    %c0_i32_1 = arith.constant 0 : i32
    return %c0_i32, %c0_i32_0 : i32, i32
  }
  func.func @transform_6(%arg0: i32) -> (i32, i32) {
    %c0_i32 = arith.constant 0 : i32
    %c0_i32_0 = arith.constant 0 : i32
    %c0_i32_1 = arith.constant 0 : i32
    return %c0_i32, %c0_i32_0 : i32, i32
  }
  func.func @transform_7(%arg0: i32) -> (i32, i32) {
    %c0_i32 = arith.constant 0 : i32
    %c0_i32_0 = arith.constant 0 : i32
    return %arg0, %c0_i32 : i32, i32
  }
}

</mosaic_0001>

<bundles_post_ra>
// kernel: tpu_custom_call.1
= control target key start
LH: loop header
LB: loop body
LE: loop exit
PB: predicated region body
PF: predicated region fallthrough
CT: control target
= control target key end

     0   :  { %12 = vsyncpa [#allocation3], 0  ;;  %s689_s0 = inlined_call_operand.vmem [shape: f32[8,4], index: 0, kind: input, shape index: {}]   ;;  %s690_s1 = inlined_call_operand.vmem [shape: f32[4,128], index: 1, kind: input, shape index: {}]   ;;  %s691_s2 = inlined_call_operand.vmem [shape: f32[1,128], index: 2, kind: input, shape index: {}]   ;;  %s692_s3 = inlined_call_operand.hbm [shape: f32[128,128], index: 3, kind: input, shape index: {}]   ;;  %s693_s4 = inlined_call_operand.vmem [shape: f32[1,128], index: 4, kind: input, shape index: {}]   ;;  %s694_s5 = inlined_call_operand.hbm [shape: f32[128,128], index: 5, kind: input, shape index: {}]   ;;  %s695_s6 = inlined_call_operand.vmem [shape: f32[1,128], index: 6, kind: input, shape index: {}]   ;;  %s696_s7 = inlined_call_operand.hbm [shape: f32[8,128], index: 7, kind: output, shape index: {}]  }
   0x1   :  { %13 = vsyncpa [#allocation6], 0 }
   0x2   :  { %14 = vsyncpa [#allocation4], 0  ;;  %s561_s24 = smov [#allocation2]   ;;  %s489_s28 = scalar_lea.hbm %s692_s3, 2048 }
   0x3   :  { %s26_s25 = sshll.u32 %s561_s24, 4  ;;  %p490_p0 = scmp.ne.s32.totalorder %s692_s3, %s489_s28  ;;  %s27_s25 = int_to_ptr.vmem [resolvable:$true] %s26_s25 }
   0x4   :  { %p493_p1 = scmp.lt.u32.totalorder %s489_s28, %s692_s3 }
   0x6   :  { %p495_p2 = pnand %p493_p1, %p490_p0 }
   0x8   :  { %498 = shalt.err (!%p495_p2)
}
   0x9   :  { %s499_s10 = scalar_lea.vmem %s27_s25, 2048  ;;  %p504_p4 = scmp.lt.s32.totalorder %s27_s25, %s27_s25 }
   0xa   :  { %p500_p3 = scmp.ne.s32.totalorder %s27_s25, %s499_s10  ;;  %p505_p5 = scmp.lt.s32.totalorder %s499_s10, %s499_s10 }
   0xc   :  { %p506_p6 = por %p505_p5, %p504_p4 }
   0xe   :  { %p507_p7 = pnand %p506_p6, %p500_p3 }
  0x10   :  { %510 = shalt.err (!%p507_p7)
}
  0x11   :  { %s562_s11 = smov 128   ;;  %s563_s12 = smov 8  }
  0x12   :  { %32 = dma.hbm_to_vmem [thread:$0]  %s692_s3, 2048, %s27_s25, [#allocation3], %s562_s11, %s562_s11, %s563_s12  }
  0x13   :  { %s564_s15 = smov [#allocation5]   ;;  %s511_s19 = scalar_lea.hbm %s694_s5, 2048 }
  0x14   :  { %s40_s16 = sshll.u32 %s564_s15, 4  ;;  %p512_p8 = scmp.ne.s32.totalorder %s694_s5, %s511_s19  ;;  %s41_s16 = int_to_ptr.vmem [resolvable:$true] %s40_s16 }
  0x15   :  { %p515_p9 = scmp.lt.u32.totalorder %s511_s19, %s694_s5 }
  0x17   :  { %p517_p10 = pnand %p515_p9, %p512_p8 }
  0x19   :  { %520 = shalt.err (!%p517_p10)
}
  0x1a   :  { %s521_s24 = scalar_lea.vmem %s41_s16, 2048  ;;  %p526_p12 = scmp.lt.s32.totalorder %s41_s16, %s41_s16 }
  0x1b   :  { %p522_p11 = scmp.ne.s32.totalorder %s41_s16, %s521_s24  ;;  %p527_p13 = scmp.lt.s32.totalorder %s521_s24, %s521_s24 }
  0x1d   :  { %p528_p0 = por %p527_p13, %p526_p12 }
  0x1f   :  { %p529_p1 = pnand %p528_p0, %p522_p11 }
  0x21   :  { %532 = shalt.err (!%p529_p1)
}
  0x22   :  { %46 = dma.hbm_to_vmem [thread:$0]  %s694_s5, 2048, %s41_s16, [#allocation6], %s562_s11, %s562_s11, %s563_s12  }
  0x23   :  { %555 = dma.done.wait [#allocation3], 2048  }
  0x24   :  { %556 = vsyncadd [#allocation3], 4294965248 }
  0x25   :  { %557 = dma.done.wait [#allocation6], 2048  }
  0x26   :  { %558 = vsyncadd [#allocation6], 4294965248  ;;  %v565_v0 = vmov 0   ;;  %v566_v1 = vmov 2   ;;  %v567_v2 = vmov 0.0|0.0   ;;  %v55_v3 = vld [vmem:[%s689_s0] sm:$0xff] }
  0x27   :  { %484 = vset.pattern.permute.xlu0 %v565_v0  ;;  %486 = vset.pattern.permute.xlu1 %v566_v1  ;;  %v109_v4 = vld [vmem:[#allocation2] sm:$0xff]  ;;  %v110_v5 = vld [vmem:[#allocation2 + $0x8] sm:$0xff]  ;;  %v111_v7 = vld [vmem:[#allocation2 + $0x10] sm:$0xff]  ;;  %v568_v12 = vmov 1   ;;  %v569_v13 = vmov 3   ;;  %vm570_vm0 = vmmov 0  }
  0x28   :  { %424 = vmatprep.subr.bf16.mxu0 %v567_v2  ;;  %448 = vmatprep.subr.bf16.mxu1 %v567_v2  ;;  %v425_v6 = vpack.c.bf16 %v110_v5, %v109_v4  ;;  %v112_v8 = vld [vmem:[#allocation2 + $0x18] sm:$0xff]  ;;  %v113_v10 = vld [vmem:[#allocation2 + $0x20] sm:$0xff]  ;;  %v114_v11 = vld [vmem:[#allocation2 + $0x28] sm:$0xff]  ;;  %v571_v23 = vmov 0.0   ;;  %s572_s15 = smov [#allocation7]  }
  0x29   :  { %60 = vperm.xlu0 %484, %v55_v3   ;;  %88 = vperm.xlu1 %486, %v55_v3   ;;  %v428_v9 = vpack.c.bf16 %v112_v8, %v111_v7  ;;  %v431_v14 = vpack.c.bf16 %v114_v11, %v113_v10  ;;  %v115_v15 = vld [vmem:[#allocation2 + $0x30] sm:$0xff]  ;;  %v116_v16 = vld [vmem:[#allocation2 + $0x38] sm:$0xff]  ;;  %v117_v18 = vld [vmem:[#allocation2 + $0x40] sm:$0xff]  ;;  %s303_s16 = sshll.u32 %s572_s15, 4  ;;  %s304_s16 = int_to_ptr.vmem [resolvable:$true] %s303_s16 }
  0x2a   :  { %426 = vmatpush3.bf16.msra.mxu0 %v425_v6  ;;  %v434_v17 = vpack.c.bf16 %v116_v16, %v115_v15  ;;  %v118_v19 = vld [vmem:[#allocation2 + $0x48] sm:$0xff]  ;;  %v119_v21 = vld [vmem:[#allocation2 + $0x50] sm:$0xff]  ;;  %v120_v22 = vld [vmem:[#allocation2 + $0x58] sm:$0xff]  ;;  %386 = vmatprep.mubr.msk.f32.mxu0 %vm570_vm0, %v571_v23  ;;  %s533_s17 = scalar_lea.vmem %s304_s16, 128  ;;  %p538_p3 = scmp.lt.s32.totalorder %s304_s16, %s304_s16 }
  0x2b   :  { %427 = vmatprep.subr.bf16.mxu0 %v567_v2  ;;  %v437_v20 = vpack.c.bf16 %v118_v19, %v117_v18  ;;  %v203_v24 = vld [vmem:[#allocation5] sm:$0xff]  ;;  %v204_v25 = vld [vmem:[#allocation5 + $0x8] sm:$0xff]  ;;  %v205_v26 = vld [vmem:[#allocation5 + $0x10] sm:$0xff]  ;;  %421 = vmatprep.mubr.msk.f32.mxu1 %vm570_vm0, %v571_v23  ;;  %v440_v29 = vpack.c.bf16 %v120_v22, %v119_v21  ;;  %p534_p2 = scmp.ne.s32.totalorder %s304_s16, %s533_s17  ;;  %p539_p4 = scmp.lt.s32.totalorder %s533_s17, %s533_s17 }
  0x2c   :  { %v449_v27 = vpack.c.bf16 %v204_v25, %v203_v24  ;;  %v206_v28 = vld [vmem:[#allocation5 + $0x18] sm:$0xff]  ;;  %v121_v30 = vld [vmem:[#allocation2 + $0x60] sm:$0xff]  ;;  %v122_v32 = vld [vmem:[#allocation2 + $0x68] sm:$0xff] }
  0x2d   :  { %485 = vset.pattern.permute.xlu0 %v568_v12  ;;  %487 = vset.pattern.permute.xlu1 %v569_v13  ;;  %v452_v31 = vpack.c.bf16 %v206_v28, %v205_v26  ;;  %v207_v33 = vld [vmem:[#allocation5 + $0x20] sm:$0xff]  ;;  %v208_v34 = vld [vmem:[#allocation5 + $0x28] sm:$0xff]  ;;  %v443_v35 = vpack.c.bf16 %v122_v32, %v121_v30  ;;  %v123_v36 = vld [vmem:[#allocation2 + $0x70] sm:$0xff]  ;;  %p540_p5 = por %p539_p4, %p538_p3 }
  0x2e   :  { %77 = vperm.xlu0 %485, %v55_v3   ;;  %99 = vperm.xlu1 %487, %v55_v3   ;;  %v455_v37 = vpack.c.bf16 %v208_v34, %v207_v33  ;;  %v124_v38 = vld [vmem:[#allocation2 + $0x78] sm:$0xff]  ;;  %v209_v39 = vld [vmem:[#allocation5 + $0x30] sm:$0xff]  ;;  %v211_v43 = vld [vmem:[#allocation5 + $0x40] sm:$0xff] }
  0x2f   :  { %429 = vmatpush3.bf16.msra.mxu0 %v428_v9  ;;  %450 = vmatpush3.bf16.msra.mxu1 %v449_v27  ;;  %v210_v40 = vld [vmem:[#allocation5 + $0x38] sm:$0xff]  ;;  %v446_v41 = vpack.c.bf16 %v124_v38, %v123_v36  ;;  %v212_v44 = vld [vmem:[#allocation5 + $0x48] sm:$0xff]  ;;  %v213_v46 = vld [vmem:[#allocation5 + $0x50] sm:$0xff]  ;;  %p541_p6 = pnand %p540_p5, %p534_p2 }
  0x30   :  { %430 = vmatprep.subr.bf16.mxu0 %v567_v2  ;;  %451 = vmatprep.subr.bf16.mxu1 %v567_v2  ;;  %v458_v42 = vpack.c.bf16 %v210_v40, %v209_v39  ;;  %v461_v45 = vpack.c.bf16 %v212_v44, %v211_v43  ;;  %v214_v47 = vld [vmem:[#allocation5 + $0x58] sm:$0xff]  ;;  %v215_v49 = vld [vmem:[#allocation5 + $0x60] sm:$0xff]  ;;  %v216_v50 = vld [vmem:[#allocation5 + $0x68] sm:$0xff] }
  0x31   :  { %v464_v48 = vpack.c.bf16 %v214_v47, %v213_v46  ;;  %v467_v51 = vpack.c.bf16 %v216_v50, %v215_v49  ;;  %v313_v52 = vld [vmem:[%s690_s1] ss:$0 sm:$0xff]  ;;  %v315_v57 = vld [vmem:[%s690_s1 + $0x1] ss:$0 sm:$0xff]  ;;  %v316_v58 = vld [vmem:[%s690_s1 + $0x2] ss:$0 sm:$0xff] }
  0x32   :  { %488 = vset.pattern.permute.xlu0 %v569_v13  ;;  %v314_v56 = vld [vmem:[%s691_s2] ss:$0 sm:$0xff]  ;;  %v317_v60 = vld [vmem:[%s690_s1 + $0x3] ss:$0 sm:$0xff]  ;;  %v217_v6 = vld [vmem:[#allocation5 + $0x70] sm:$0xff] }
  0x33   :  { %432 = vmatpush3.bf16.msra.mxu0 %v431_v14  ;;  %453 = vmatpush3.bf16.msra.mxu1 %v452_v31  ;;  %v218_v7 = vld [vmem:[#allocation5 + $0x78] sm:$0xff]  ;;  %v318_v9 = vld [vmem:[%s693_s4] ss:$0 sm:$0xff] }
  0x34   :  { %433 = vmatprep.subr.bf16.mxu0 %v567_v2  ;;  %454 = vmatprep.subr.bf16.mxu1 %v567_v2  ;;  %v470_v8 = vpack.c.bf16 %v218_v7, %v217_v6  ;;  %v319_v14 = vld [vmem:[%s695_s6] ss:$0 sm:$0xff] }
  0x37   :  { %435 = vmatpush3.bf16.msra.mxu0 %v434_v17  ;;  %456 = vmatpush3.bf16.msra.mxu1 %v455_v37 }
  0x38   :  { %436 = vmatprep.subr.bf16.mxu0 %v567_v2  ;;  %457 = vmatprep.subr.bf16.mxu1 %v567_v2 }
  0x3b   :  { %438 = vmatpush3.bf16.msra.mxu0 %v437_v20  ;;  %459 = vmatpush3.bf16.msra.mxu1 %v458_v42 }
  0x3c   :  { %439 = vmatprep.subr.bf16.mxu0 %v567_v2  ;;  %460 = vmatprep.subr.bf16.mxu1 %v567_v2 }
  0x3f   :  { %441 = vmatpush3.bf16.msra.mxu0 %v440_v29  ;;  %462 = vmatpush3.bf16.msra.mxu1 %v461_v45 }
  0x40   :  { %442 = vmatprep.subr.bf16.mxu0 %v567_v2  ;;  %463 = vmatprep.subr.bf16.mxu1 %v567_v2 }
  0x43   :  { %444 = vmatpush3.bf16.msra.mxu0 %v443_v35  ;;  %465 = vmatpush3.bf16.msra.mxu1 %v464_v48 }
  0x44   :  { %445 = vmatprep.subr.bf16.mxu0 %v567_v2  ;;  %466 = vmatprep.subr.bf16.mxu1 %v567_v2 }
  0x47   :  { %447 = vmatpush3.bf16.msra.mxu0 %v446_v41  ;;  %468 = vmatpush3.bf16.msra.mxu1 %v467_v51 }
  0x48   :  { %469 = vmatprep.subr.bf16.mxu1 %v567_v2 }
  0x4b   :  { %471 = vmatpush3.bf16.msra.mxu1 %v470_v8 }
  0xa8   :  { %v61_v53 = vpop.permute.xlu0 %60  ;;  %v89_v54 = vpop.permute.xlu1 %88 }
  0xa9   :  { %v67_v55 = vmul.f32 %v313_v52, %v61_v53  ;;  %v95_v0 = vmul.f32 %v316_v58, %v89_v54 }
  0xab   :  { %v74_v62 = vadd.f32 %v314_v56, %v67_v55 }
  0xad   :  { %v78_v59 = vpop.permute.xlu0 %77  ;;  %v100_v61 = vpop.permute.xlu1 %99 }
  0xae   :  { %v84_v63 = vmul.f32 %v315_v57, %v78_v59  ;;  %v106_v2 = vmul.f32 %v317_v60, %v100_v61 }
  0xb0   :  { %v85_v1 = vadd.f32 %v84_v63, %v74_v62 }
  0xb2   :  { %v96_v3 = vadd.f32 %v95_v0, %v85_v1 }
  0xb4   :  { %v107_v4 = vadd.f32 %v106_v2, %v96_v3 }
  0xb6   :  { %v108_v5 = vmax.f32 %v107_v4, 0.0 }
  0xb8   :  { %387 = vmatmul.mubr.f32.vlgmr.msra.gmra.mrb[0].mxu0 %v108_v5 }
 0x18b   :  { %v198_v10 = vpop.f32.mrb[0].mxu0 }
 0x18c   :  { %v199_v11 = vadd.f32 %v318_v9, %v198_v10  ;;  %v388_v12 = vpop.f32.mrb[1].mxu0 }
 0x18e   :  { %v202_v13 = vmax.f32 %v199_v11, 0.0 }
 0x190   :  { %422 = vmatmul.mubr.f32.vlgmr.msra.gmra.mrb[0].mxu1 %v202_v13 }
 0x263   :  { %v292_v15 = vpop.f32.mrb[0].mxu1 }
 0x264   :  { %v293_v16 = vadd.f32 %v319_v14, %v292_v15  ;;  %v423_v17 = vpop.f32.mrb[1].mxu1 }
 0x266   :  { %296 = vst [vmem:[#allocation7] sm:$0xff] %v293_v16 }
 0x267   :  { %544 = shalt.err (!%p541_p6)
}
 0x268   :  { %s545_s19 = scalar_lea.hbm %s696_s7, 128 }
 0x269   :  { %p546_p7 = scmp.ne.s32.totalorder %s696_s7, %s545_s19  ;;  %p549_p8 = scmp.lt.u32.totalorder %s545_s19, %s696_s7 }
 0x26b   :  { %p551_p9 = pnand %p549_p8, %p546_p7 }
 0x26d   :  { %554 = shalt.err (!%p551_p9)
}
 0x26e   :  { %306 = dma.vmem_to_hbm [thread:$0]  %s304_s16, 128, %s696_s7, [#allocation4]  }
 0x26f   :  { %559 = dma.done.wait [#allocation4], 128  }
 0x270   :  { %560 = vsyncadd [#allocation4], 4294967168 }
 0x271   :  { %310 = vsyncpa [#allocation3], 1 }
 0x272   :  { %311 = vsyncpa [#allocation6], 1 }
 0x273   :  { %312 = vsyncpa [#allocation4], 1 }

</bundles_post_ra>
